<compile_context>
chip_gen: v7x
topology: tpu7x:2x2x1
jax: 0.10.0
libtpu: 0.0.40
codegen_flags: <defaults>
</compile_context>

<pallas_src>
import functools

import jax
import jax.numpy as jnp
from jax import lax
from jax.experimental import pallas as pl
from jax.experimental.pallas import tpu as pltpu


def _cam_kernel(gamma_ref, x_ref, out_ref, energy_ref, attn_ref, *, nt):
    """Two-phase channel-attention kernel.

    grid = (B // bt, 2 * nt).  For each batch block, steps s in [0, nt) stream
    spatial tiles and accumulate energy = x @ x^T (contracted over spatial);
    the softmax is computed at s == nt - 1; steps s in [nt, 2*nt) re-stream
    the same tiles and emit out_tile = gamma * (attn @ x_tile) + x_tile.
    """
    s = pl.program_id(1)

    x = x_ref[...]  # (bt, C, tn), native dtype (bf16 or f32)

    # ---- phase 0: accumulate the (bt, C, C) Gram matrix -------------------
    @pl.when(s == 0)
    def _():
        energy_ref[...] = jnp.zeros_like(energy_ref)

    @pl.when(s < nt)
    def _():
        # Contract the spatial axis of x with itself directly (no transpose);
        # MXU accumulates in f32 regardless of the input dtype.
        energy_ref[...] += lax.dot_general(
            x, x,
            dimension_numbers=(((2,), (2,)), ((0,), (0,))),
            preferred_element_type=jnp.float32,
        )

    # ---- softmax(rowmax(E) - E) == exp(rowmin(E) - E) / rowsum ------------
    @pl.when(s == nt - 1)
    def _():
        energy = energy_ref[...]                               # (bt, C, C) f32
        e_min = jnp.min(energy, axis=-1, keepdims=True)
        e = jnp.exp(e_min - energy)                            # args <= 0
        inv = pl.reciprocal(jnp.sum(e, axis=-1, keepdims=True), approx=True)
        attn_ref[...] = (e * inv).astype(attn_ref.dtype)

    # ---- phase 1: out_tile = gamma * (attn @ x_tile) + x_tile --------------
    @pl.when(s >= nt)
    def _():
        attn = attn_ref[...]                                   # (bt, C, C), x dtype
        out = lax.dot_general(
            attn, x,
            dimension_numbers=(((2,), (1,)), ((0,), (0,))),
            preferred_element_type=jnp.float32,
        )
        gamma = gamma_ref[0]                                   # f32 scalar (SMEM)
        out_ref[...] = (gamma * out + x.astype(jnp.float32)).astype(out_ref.dtype)


def _pick_spatial_tile(n, max_tn=512):
    """Largest multiple of 128 (<= max_tn) dividing n; else the full n."""
    if n % 128 == 0:
        for t in range(min(max_tn, n), 0, -128):
            if n % t == 0:
                return t
    return n


def _pick_batch_tile(b, c, tn, itemsize, budget_bytes=4 << 20):
    """Largest divisor of b whose per-step working set fits the budget."""
    per_b = 2 * c * tn * itemsize          # x block + out block (one buffer each)
    per_b += c * c * (4 + itemsize)        # energy (f32) + attn scratch
    bt = max(1, min(b, budget_bytes // max(per_b, 1)))
    while b % bt:
        bt -= 1
    return bt


def cam_module(x, gamma):
    """Channel attention forward.

    Args:
      x: (B, C, H, W) float array (NCHW, matching the PyTorch module).
      gamma: scalar parameter, shape (1,).
    Returns:
      out: (B, C, H, W), same dtype as x.
    """
    B, C, H, W = x.shape
    N = H * W
    x_flat = x.reshape(B, C, N)
    gamma = jnp.asarray(gamma, jnp.float32).reshape((1,))

    tn = _pick_spatial_tile(N)
    nt = N // tn
    bt = _pick_batch_tile(B, C, tn, x.dtype.itemsize)

    kernel = functools.partial(_cam_kernel, nt=nt)

    out_flat = pl.pallas_call(
        kernel,
        out_shape=jax.ShapeDtypeStruct((B, C, N), x.dtype),
        grid_spec=pltpu.PrefetchScalarGridSpec(
            num_scalar_prefetch=0,
            grid=(B // bt, 2 * nt),
            in_specs=[
                # gamma: tiny scalar parameter, lives in SMEM for the whole call.
                pl.BlockSpec(memory_space=pltpu.MemorySpace.SMEM),
                # x: one (bt, C, tn) spatial tile per step; the same tile
                # sequence is replayed for phase 1 (s >= nt).
                pl.BlockSpec((bt, C, tn), lambda b, s: (b, 0, s % nt)),
            ],
            # Output block index stays at tile 0 during phase 0 (nothing is
            # written there, no writeback happens since the index is constant),
            # then tracks the phase-1 tile -> each HBM tile is written exactly
            # once, right after its phase-1 step.
            out_specs=pl.BlockSpec(
                (bt, C, tn), lambda b, s: (b, 0, jnp.maximum(s - nt, 0))),
            scratch_shapes=[
                pltpu.VMEM((bt, C, C), jnp.float32),   # energy accumulator
                pltpu.VMEM((bt, C, C), x.dtype),       # attention weights
            ],
        ),
        compiler_params=pltpu.CompilerParams(
            dimension_semantics=("parallel", "arbitrary"),
        ),
        # TODO(synk): input_output_aliases={1: 0} would let the output reuse
        # x's HBM buffer (each tile's last read precedes its writeback); left
        # off so the caller's x stays valid.
    )(gamma, x_flat)

    return out_flat.reshape(B, C, H, W)


def _reference(x, gamma):
    # Pure-JAX reference mirroring the PyTorch forward (f32 math).
    B, C, H, W = x.shape
    q = x.reshape(B, C, H * W).astype(jnp.float32)
    energy = jnp.einsum("bcn,bdn->bcd", q, q)
    energy_new = jnp.max(energy, axis=-1, keepdims=True) - energy
    attn = jax.nn.softmax(energy_new, axis=-1)
    out = jnp.einsum("bcd,bdn->bcn", attn, q).reshape(B, C, H, W)
    return gamma[0] * out + q.reshape(B, C, H, W)


if __name__ == "__main__":
    key = jax.random.PRNGKey(0)

    # --- case 1: the module's nominal small shape (single N tile) ----------
    B, C, H, W = 2, 4, 16, 16
    x = jax.random.normal(key, (B, C, H, W), dtype=jnp.float32)

    gamma_zero = jnp.zeros((1,), dtype=jnp.float32)   # nn.Parameter(zeros(1))
    gamma_test = jnp.array([0.5], dtype=jnp.float32)

    out0 = jax.block_until_ready(cam_module(x, gamma_zero))
    out1 = jax.block_until_ready(cam_module(x, gamma_test))
    ref0 = _reference(x, gamma_zero)
    ref1 = _reference(x, gamma_test)

    assert out0.shape == (B, C, H, W)
    assert out0.dtype == x.dtype
    # Tolerance accounts for the EUP approximate reciprocal in the softmax.
    assert jnp.allclose(out0, ref0, atol=1e-2, rtol=1e-2)
    assert jnp.allclose(out1, ref1, atol=1e-2, rtol=1e-2)

    # --- case 2: larger spatial extent -> exercises the multi-tile (nt > 1)
    #             energy accumulation and phase-1 tile writeback ------------
    key2 = jax.random.PRNGKey(1)
    x2 = jax.random.normal(key2, (2, 16, 32, 32), dtype=jnp.float32)
    out2 = jax.block_until_ready(cam_module(x2, gamma_test))
    ref2 = _reference(x2, gamma_test)
    assert jnp.allclose(out2, ref2, atol=1e-2, rtol=1e-2)

    # --- case 3: bf16 inputs -> matmuls run at native bf16 MXU rate with
    #             f32 accumulation; looser tolerance for bf16 rounding ------
    x_bf16 = x.astype(jnp.bfloat16)
    out_bf16 = jax.block_until_ready(cam_module(x_bf16, gamma_test))
    ref_bf16 = _reference(x_bf16, gamma_test)
    assert out_bf16.dtype == jnp.bfloat16
    assert jnp.allclose(out_bf16.astype(jnp.float32), ref_bf16,
                        atol=1e-1, rtol=1e-1)

    print("KERNEL_OK")
</pallas_src>

<mosaic_0001>
module attributes {stable_mosaic.version = 11 : i64} {
  func.func @_cam_kernel(%arg0: i32, %arg1: i32, %arg2: memref<1xf32, #tpu.memory_space<smem>>, %arg3: memref<2x4x256xf32, #tpu.memory_space<vmem>>, %arg4: memref<2x4x256xf32, #tpu.memory_space<vmem>>, %arg5: memref<2x4x4xf32, #tpu.memory_space<vmem>>, %arg6: memref<2x4x4xf32, #tpu.memory_space<vmem>>) attributes {dimension_semantics = [#tpu.dimension_semantics<parallel>, #tpu.dimension_semantics<arbitrary>], iteration_bounds = array<i64: 1, 2>, scalar_prefetch = 0 : i64, scratch_operands = 2 : i64, tpu.core_type = #tpu.core_type<tc>, window_params = [{transform_indices = @transform_0, window_bounds = array<i64: 1>}, {transform_indices = @transform_1, window_bounds = array<i64: 2, 4, 256>}, {transform_indices = @transform_2, window_bounds = array<i64: 2, 4, 256>}]} {
    %c0 = arith.constant 0 : index
    %c0_0 = arith.constant 0 : index
    %c0_1 = arith.constant 0 : index
    %0 = vector.load %arg3[%c0, %c0_0, %c0_1] : memref<2x4x256xf32, #tpu.memory_space<vmem>>, vector<2x4x256xf32>
    %c0_i32 = arith.constant 0 : i32
    %1 = arith.cmpi eq, %arg1, %c0_i32 : i32
    %2 = arith.extui %1 : i1 to i32
    %c0_i32_2 = arith.constant 0 : i32
    %3 = arith.cmpi ne, %2, %c0_i32_2 : i32
    scf.if %3 {
      %cst = arith.constant 0.000000e+00 : f32
      %13 = vector.broadcast %cst : f32 to vector<2x4x4xf32>
      %c0_8 = arith.constant 0 : index
      %c0_9 = arith.constant 0 : index
      %c0_10 = arith.constant 0 : index
      %14 = vector.load %arg5[%c0_8, %c0_9, %c0_10] : memref<2x4x4xf32, #tpu.memory_space<vmem>>, vector<2x4x4xf32>
      tpu.vector_store %arg5[%c0_8, %c0_9, %c0_10], %13 {strides = array<i32>} : memref<2x4x4xf32, #tpu.memory_space<vmem>>, vector<2x4x4xf32>,
    } else {
    }
    %c1_i32 = arith.constant 1 : i32
    %4 = arith.cmpi slt, %arg1, %c1_i32 : i32
    %5 = arith.extui %4 : i1 to i32
    %c0_i32_3 = arith.constant 0 : i32
    %6 = arith.cmpi ne, %5, %c0_i32_3 : i32
    scf.if %6 {
      %c0_8 = arith.constant 0 : index
      %c0_9 = arith.constant 0 : index
      %c0_10 = arith.constant 0 : index
      %13 = vector.load %arg5[%c0_8, %c0_9, %c0_10] : memref<2x4x4xf32, #tpu.memory_space<vmem>>, vector<2x4x4xf32>
      %cst = arith.constant dense<0.000000e+00> : vector<2x4x4xf32>
      %14 = tpu.matmul %0, %0, %cst {dimension_numbers = #tpu.dot_dimension_numbers<[2], [2], [1], [1], [0, 0, 0, 1, 1, 1], [0], [0]>} : vector<2x4x256xf32>, vector<2x4x256xf32>, vector<2x4x4xf32> -> vector<2x4x4xf32>
      %15 = arith.addf %13, %14 : vector<2x4x4xf32>
      %c0_11 = arith.constant 0 : index
      %c0_12 = arith.constant 0 : index
      %c0_13 = arith.constant 0 : index
      %16 = vector.load %arg5[%c0_11, %c0_12, %c0_13] : memref<2x4x4xf32, #tpu.memory_space<vmem>>, vector<2x4x4xf32>
      tpu.vector_store %arg5[%c0_11, %c0_12, %c0_13], %15 {strides = array<i32>} : memref<2x4x4xf32, #tpu.memory_space<vmem>>, vector<2x4x4xf32>,
    } else {
    }
    %c0_i32_4 = arith.constant 0 : i32
    %7 = arith.cmpi eq, %arg1, %c0_i32_4 : i32
    %8 = arith.extui %7 : i1 to i32
    %c0_i32_5 = arith.constant 0 : i32
    %9 = arith.cmpi ne, %8, %c0_i32_5 : i32
    scf.if %9 {
      %c0_8 = arith.constant 0 : index
      %c0_9 = arith.constant 0 : index
      %c0_10 = arith.constant 0 : index
      %13 = vector.load %arg5[%c0_8, %c0_9, %c0_10] : memref<2x4x4xf32, #tpu.memory_space<vmem>>, vector<2x4x4xf32>
      %cst = arith.constant dense<0x7F800000> : vector<2x4xf32>
      %14 = vector.multi_reduction <minimumf>, %13, %cst [2] : vector<2x4x4xf32> to vector<2x4xf32>
      %15 = vector.shape_cast %14 : vector<2x4xf32> to vector<2x4x1xf32>
      %16 = vector.broadcast %15 : vector<2x4x1xf32> to vector<2x4x4xf32>
      %17 = arith.subf %16, %13 : vector<2x4x4xf32>
      %18 = math.exp %17 : vector<2x4x4xf32>
      %cst_11 = arith.constant dense<0.000000e+00> : vector<2x4xf32>
      %19 = vector.multi_reduction <add>, %18, %cst_11 [2] : vector<2x4x4xf32> to vector<2x4xf32>
      %20 = vector.shape_cast %19 : vector<2x4xf32> to vector<2x4x1xf32>
      %21 = tpu.reciprocal %20 {approx = true} : vector<2x4x1xf32> -> vector<2x4x1xf32>
      %22 = vector.broadcast %21 : vector<2x4x1xf32> to vector<2x4x4xf32>
      %23 = arith.mulf %18, %22 : vector<2x4x4xf32>
      %c0_12 = arith.constant 0 : index
      %c0_13 = arith.constant 0 : index
      %c0_14 = arith.constant 0 : index
      %24 = vector.load %arg6[%c0_12, %c0_13, %c0_14] : memref<2x4x4xf32, #tpu.memory_space<vmem>>, vector<2x4x4xf32>
      tpu.vector_store %arg6[%c0_12, %c0_13, %c0_14], %23 {strides = array<i32>} : memref<2x4x4xf32, #tpu.memory_space<vmem>>, vector<2x4x4xf32>,
    } else {
    }
    %c1_i32_6 = arith.constant 1 : i32
    %10 = arith.cmpi sge, %arg1, %c1_i32_6 : i32
    %11 = arith.extui %10 : i1 to i32
    %c0_i32_7 = arith.constant 0 : i32
    %12 = arith.cmpi ne, %11, %c0_i32_7 : i32
    scf.if %12 {
      %c0_8 = arith.constant 0 : index
      %c0_9 = arith.constant 0 : index
      %c0_10 = arith.constant 0 : index
      %13 = vector.load %arg6[%c0_8, %c0_9, %c0_10] : memref<2x4x4xf32, #tpu.memory_space<vmem>>, vector<2x4x4xf32>
      %cst = arith.constant dense<0.000000e+00> : vector<2x4x256xf32>
      %14 = tpu.matmul %13, %0, %cst {dimension_numbers = #tpu.dot_dimension_numbers<[2], [1], [1], [2], [0, 0, 0, 1, 1, 2], [0], [0]>} : vector<2x4x4xf32>, vector<2x4x256xf32>, vector<2x4x256xf32> -> vector<2x4x256xf32>
      %c0_11 = arith.constant 0 : index
      %15 = memref.load %arg2[%c0_11] : memref<1xf32, #tpu.memory_space<smem>>
      %16 = vector.broadcast %15 : f32 to vector<2x4x256xf32>
      %17 = arith.mulf %16, %14 : vector<2x4x256xf32>
      %18 = arith.addf %17, %0 : vector<2x4x256xf32>
      %c0_12 = arith.constant 0 : index
      %c0_13 = arith.constant 0 : index
      %c0_14 = arith.constant 0 : index
      %19 = vector.load %arg4[%c0_12, %c0_13, %c0_14] : memref<2x4x256xf32, #tpu.memory_space<vmem>>, vector<2x4x256xf32>
      tpu.vector_store %arg4[%c0_12, %c0_13, %c0_14], %18 {strides = array<i32>} : memref<2x4x256xf32, #tpu.memory_space<vmem>>, vector<2x4x256xf32>,
    } else {
    }
    return
  }
  func.func @transform_0(%arg0: i32, %arg1: i32) -> i32 {
    %c0_i32 = arith.constant 0 : i32
    %c0_i32_0 = arith.constant 0 : i32
    return %c0_i32 : i32
  }
  func.func @transform_1(%arg0: i32, %arg1: i32) -> (i32, i32, i32) {
    %c1_i32 = arith.constant 1 : i32
    %c0_i32 = arith.constant 0 : i32
    %0 = arith.cmpi eq, %c1_i32, %c0_i32 : i32
    %c1_i32_0 = arith.constant 1 : i32
    %1 = arith.select %0, %c1_i32_0, %c1_i32 : i32
    %2 = arith.remsi %arg1, %1 : i32
    %c0_i32_1 = arith.constant 0 : i32
    %3 = arith.cmpi ne, %2, %c0_i32_1 : i32
    %c0_i32_2 = arith.constant 0 : i32
    %4 = arith.cmpi slt, %2, %c0_i32_2 : i32
    %c0_i32_3 = arith.constant 0 : i32
    %5 = arith.cmpi slt, %1, %c0_i32_3 : i32
    %6 = arith.xori %4, %5 : i1
    %7 = arith.andi %6, %3 : i1
    %8 = arith.addi %2, %1 : i32
    %9 = arith.select %7, %8, %2 : i32
    %c0_i32_4 = arith.constant 0 : i32
    %c0_i32_5 = arith.constant 0 : i32
    return %arg0, %c0_i32_4, %9 : i32, i32, i32
  }
  func.func @transform_2(%arg0: i32, %arg1: i32) -> (i32, i32, i32) {
    %c1_i32 = arith.constant 1 : i32
    %0 = arith.subi %arg1, %c1_i32 : i32
    %c0_i32 = arith.constant 0 : i32
    %1 = arith.maxsi %0, %c0_i32 : i32
    %c0_i32_0 = arith.constant 0 : i32
    %c0_i32_1 = arith.constant 0 : i32
    return %arg0, %c0_i32_0, %1 : i32, i32, i32
  }
}

</mosaic_0001>

<bundles_post_ra>
// kernel: tpu_custom_call.1
= control target key start
LH: loop header
LB: loop body
LE: loop exit
PB: predicated region body
PF: predicated region fallthrough
CT: control target
= control target key end

     0   :  { %s1069_s0 = inlined_call_operand.<no memory space> [shape: f32[1], index: 0, kind: input, shape index: {}]   ;;  %s1070_s1 = inlined_call_operand.hbm [shape: f32[2,4,256], index: 1, kind: input, shape index: {}]   ;;  %s1071_s2 = inlined_call_operand.hbm [shape: f32[2,4,256], index: 2, kind: output, shape index: {}]  }
   0x1   :  { %7 = sst [smem:[#allocation4]] %s1069_s0 }
   0x2   :  { %8 = vsyncpa [#allocation6], 0 }
   0x3   :  { %9 = vsyncpa [#allocation7], 0 }
   0x4   :  { %11 = vsyncpa [#allocation7 + $0x1], 0  ;;  %s895_s11 = smov 0   ;;  %s897_s12 = smov 0  }
   0x5   :  { %s899_s13 = smov 0   ;;  %s901_s14 = smov 0  }
   0x6   :  { %s903_s15 = smov 0  }
   0x7 LB: > { %s654_s0 = sadd.s32 4294967295, %s867_s15   ;;  %s655_s16 = sadd.s32 4294967294, %s867_s15   ;;  %s867_s15 = sphi %s903_s15, %s17_s15   ;;  %s863_s14 = sphi %s901_s14, %s1087_s14   ;;  %s859_s13 = sphi %s899_s13, %s1086_s13   ;;  %s855_s12 = sphi %s897_s12, %s1059_s12   ;;  %s851_s11 = sphi %s895_s11, %s1085_s11  }
   0x8   : > { %s26_s17 = sadd.s32 1, %s863_s14  ;;  %p848_p1 = scmp.ne.s32.totalorder %s855_s12, 0 }
   0x9   : > { %p27_p0 = scmp.ge.s32.totalorder %s26_s17, 2  ;;  %p102_p2 = scmp.eq.s32.totalorder %s654_s0, 1 }
   0xa   : > { %p107_p3 = scmp.ne.s32.totalorder %s855_s12, %s851_s11  ;;  %p108_p5 = scmp.eq.s32.totalorder %s655_s16, 1 }
   0xb   : > { %s1089_s17 = smov (%p27_p0, %s26_s17), 0  ;;  %p928_p4 = por %p848_p1, %p102_p2 }
   0xc   : > { %p932_p6 = por %p108_p5, %p107_p3  ;;  %p658_p7 = scmp.ge.s32.totalorder %s867_s15, 1 }
   0xd   : > { %s1076_s18 = scalar_select %p928_p4, 1, 0 }
   0xe   : > { %s1077_s19 = scalar_select %p932_p6, 1, 0 }
   0xf   : > { %p115_p8 = scmp.lt.s32.totalorder %s867_s15, 3  ;;  %p942_p10 = scmp.eq.s32.totalorder %s654_s0, 0 }
  0x10   : > { %s869_s22 = smov [#allocation5]   ;;  %s760_s27 = scalar_lea.hbm %s1070_s1, 256 }
  0x11   : > { %p938_p9 = pnand %p658_p7, %p115_p8  ;;  %s134_s23 = sshll.u32 %s869_s22, 4  ;;  %s135_s23 = int_to_ptr.vmem [resolvable:$true] %s134_s23 }
  0x12   : > { %s1079_s21 = scalar_select %p942_p10, 1, 0 }
  0x13   : > { %s1078_s20 = scalar_select %p938_p9, 1, 0 }
  0x14   : > { %p686_p11 = pneg %p938_p9  ;;  %p761_p13 = scmp.ne.s32.totalorder %s1070_s1, %s760_s27 }
  0x15   : > { %p767_p3 = scmp.lt.u32.totalorder %s760_s27, %s1070_s1 }
  0x16   : > { %p950_p12 = pnand %p942_p10, %p686_p11 }
  0x18   : > { %p762_p0 = pneg %p950_p12 }
  0x1a   : > { %p763_p1 = pnand %p762_p0, %p761_p13 }
  0x1c   : > { %p764_p2 = pneg %p763_p1 }
  0x1e   : > { %p769_p5 = pnand %p767_p3, %p764_p2 }
  0x20   : > { %772 = shalt.err (!%p769_p5)
}
  0x21   : > { %s773_s4 = scalar_lea.vmem %s135_s23, 256  ;;  %p781_p6 = scmp.lt.s32.totalorder %s135_s23, %s135_s23 }
  0x22   : > { %p774_p7 = scmp.ne.s32.totalorder %s135_s23, %s773_s4  ;;  %p782_p4 = scmp.lt.s32.totalorder %s773_s4, %s773_s4 }
  0x24   : > { %p776_p8 = pnand %p774_p7, %p762_p0  ;;  %p783_p10 = por %p782_p4, %p781_p6 }
  0x26   : > { %p777_p11 = pneg %p776_p8 }
  0x28   : > { %p784_p9 = pnand %p783_p10, %p777_p11 }
  0x2a   : > { %787 = shalt.err (!%p784_p9)
}
  0x2b   : > { %s870_s5 = smov 128   ;;  %s871_s6 = smov 8  }
  0x2c   : > { %689 = dma.hbm_to_vmem [thread:$0]  (!%p950_p12), %s1070_s1, 256, %s135_s23, [#allocation6], %s870_s5, %s870_s5, %s871_s6  }
  0x2d   : > { %p1081_p13 = scmp.ne.s32.totalorder %s1078_s20, 0 }
  0x2e   : > { %p1082_p1 = scmp.ne.s32.totalorder (!%p1081_p13), %s1079_s21, 0 }
  0x2f   : > { %150 = sbr.rel (%p1081_p13) target bundleno = 867 (0x363), region = 28 }
  0x36   : > { %841 = dma.done.wait (%p1082_p1), [#allocation6], 256  }
  0x37   : > { %843 = vsyncadd (%p1082_p1), [#allocation6], 4294967040  ;;  %s164_s9 = sand.u32 1, %s855_s12   ;;  %v979_v0 = vld [vmem:[#allocation5] sm:$0xff]  ;;  %v981_v1 = vld [vmem:[#allocation5 + $0x8] sm:$0xff]  ;;  %p663_p4 = scmp.ne.s32.totalorder %s859_s13, 0 }
  0x38   : > { %s662_s10 = sshll.u32 %s164_s9, 4  ;;  %vm179_vm0 = vcmask (!%p663_p4), 27648   ;;  %v872_v2 = vmov (!%p663_p4), 0.0  }
  0x39   : > { %s983_s0 = scalar_lea.vmem [#allocation8], %s662_s10  ;;  %178 = sbr.rel (%p663_p4) target bundleno = 64 (0x40), region = 36  ;;  %180 = vst.msk [vmem:[#allocation2] sm:$0xf] (!%p663_p4), %vm179_vm0, %v872_v2  ;;  %181 = vst.msk [vmem:[#allocation2 + $0x4] sm:$0xf] (!%p663_p4), %vm179_vm0, %v872_v2 }
  0x40 PF: > { %p664_p6 = scmp.ge.s32.totalorder %s859_s13, 1 }
  0x41   : > { %v189_v3 = vcombine.high (!%p664_p6), %v979_v0, %v979_v0  ;;  %v262_v4 = vcombine.high (!%p664_p6), %v981_v1, %v981_v1  ;;  %v186_v5 = vld [vmem:[#allocation2] sm:$0xf] (!%p664_p6)  ;;  %v187_v6 = vld [vmem:[#allocation2 + $0x4] sm:$0xf] (!%p664_p6)  ;;  %vm336_vm1 = vcmask (!%p664_p6), 27648  }
  0x42   : > { %185 = sbr.rel (%p664_p6) target bundleno = 286 (0x11e), region = 40 }
  0x43   : > { %191 = vmatprep.subr.mxu0 (!%p664_p6), %v189_v3  ;;  %264 = vmatprep.subr.mxu1 (!%p664_p6), %v262_v4 }
  0x44   : > { %192 = vmatpush1.xpose.msra.mxu0 (!%p664_p6), %v979_v0  ;;  %265 = vmatpush1.xpose.msra.mxu1 (!%p664_p6), %v981_v1 }
  0x45   : > { %255 = vmatprep.mubr.f32.mxu0 (!%p664_p6), %v189_v3  ;;  %328 = vmatprep.mubr.f32.mxu1 (!%p664_p6), %v262_v4 }
  0x47   : > { %256 = vmatmul.mubr.f32.vlgmr.msra.gmra.mrb[0].mxu0 (!%p664_p6), %v979_v0  ;;  %329 = vmatmul.mubr.f32.vlgmr.msra.gmra.mrb[0].mxu1 (!%p664_p6), %v981_v1 }
 0x11a   : > { %v257_v7 = vpop.f32.mrb[0].mxu0  ;;  %v330_v8 = vpop.f32.mrb[0].mxu1 }
 0x11b   : > { %v334_v9 = vadd.f32 %v257_v7, %v186_v5  ;;  %v335_v10 = vadd.f32 %v330_v8, %v187_v6  ;;  %v259_v11 = vpop.f32.mrb[1].mxu0  ;;  %v332_v12 = vpop.f32.mrb[1].mxu1 }
 0x11d   : > { %337 = vst.msk [vmem:[#allocation2] sm:$0xf] %vm336_vm1, %v334_v9  ;;  %338 = vst.msk [vmem:[#allocation2 + $0x4] sm:$0xf] %vm336_vm1, %v335_v10 }
 0x11e PF: > { %341 = sbr.rel (%p663_p4) target bundleno = 612 (0x264), region = 44  ;;  %vm344_vm2 = vcmask (!%p663_p4), 27648  }
 0x124   : > { %v342_v13 = vld [vmem:[#allocation2] sm:$0xf] (!%p663_p4)  ;;  %v343_v14 = vld [vmem:[#allocation2 + $0x4] sm:$0xf] (!%p663_p4) }
 0x125   : > { %v345_v15 = vsel %vm344_vm2, %v342_v13, inf  ;;  %v348_v16 = vsel %vm344_vm2, %v343_v14, inf }
 0x126   : > { %346 = vmin.xlane.f32.xlu0 %v345_v15 }
 0x12a   : > { %349 = vmin.xlane.f32.xlu0 %v348_v16 }
 0x1b3   : > { %v347_v17 = vpop.xlane.xlu0 %346 }
 0x1b4   : > { %v351_v18 = vsub.f32 %v347_v17, %v342_v13 }
 0x1b6   : > { %v353_v19 = vmul.f32 1.442695, %v351_v18 }
 0x1b7   : > { %v350_v20 = vpop.xlane.xlu0 %349 }
 0x1b8   : > { %752 = vpow2.f32 %v353_v19  ;;  %v352_v21 = vsub.f32 %v350_v20, %v343_v14 }
 0x1ba   : > { %v355_v22 = vmul.f32 1.442695, %v352_v21 }
 0x1bc   : > { %754 = vpow2.f32 %v355_v22 }
 0x1c2   : > { %v753_v23 = vpop.eup %752 }
 0x1c3   : > { %v357_v24 = vsel %vm344_vm2, %v753_v23, 0.0 }
 0x1c4   : > { %358 = vadd.xlane.f32.xlu1 %v357_v24 }
 0x1c6   : > { %v755_v25 = vpop.eup %754 }
 0x1c7   : > { %v360_v26 = vsel %vm344_vm2, %v755_v25, 0.0 }
 0x1c8   : > { %361 = vadd.xlane.f32.xlu1 %v360_v26 }
 0x251   : > { %v359_v27 = vpop.xlane.xlu1 %358 }
 0x252   : > { %756 = vrcp.f32 %v359_v27 }
 0x255   : > { %v362_v28 = vpop.xlane.xlu1 %361 }
 0x256   : > { %758 = vrcp.f32 %v362_v28 }
 0x25c   : > { %v757_v29 = vpop.eup %756 }
 0x25d   : > { %v365_v30 = vmul.f32 %v757_v29, %v753_v23 }
 0x25f   : > { %367 = vst.msk [vmem:[#allocation3] sm:$0xf] %vm344_vm2, %v365_v30 }
 0x260   : > { %v759_v31 = vpop.eup %758 }
 0x261   : > { %v366_v32 = vmul.f32 %v759_v31, %v755_v25 }
 0x263   : > { %368 = vst.msk [vmem:[#allocation3 + $0x4] sm:$0xf] %vm344_vm2, %v366_v32 }
 0x264 PF: > { %p666_p9 = scmp.lt.s32.totalorder %s859_s13, 1 }
 0x265   : > { %v376_v33 = vcombine.high (!%p666_p9), %v979_v0, %v979_v0  ;;  %vm381_vm3 = vcmask (!%p666_p9), 1043456   ;;  %v458_v34 = vcombine.high (!%p666_p9), %v981_v1, %v981_v1  ;;  %v873_v35 = vmov (!%p666_p9), 0.0   ;;  %s537_s16 = sld [smem:[#allocation4]] (!%p666_p9) }
 0x266   : > { %372 = sbr.rel (%p666_p9) target bundleno = 839 (0x347), region = 48  ;;  %450 = vmatprep.mubr.f32.mxu0 (!%p666_p9), %v873_v35  ;;  %530 = vmatprep.mubr.f32.mxu1 (!%p666_p9), %v873_v35  ;;  %v373_v36 = vld [vmem:[#allocation3] sm:$0xf] (!%p666_p9)  ;;  %vm377_vm4 = vcmask (!%p666_p9), 31744  }
 0x267   : > { %667 = vmatprep.subr.msk.mxu0 (!%p666_p9), %vm381_vm3, %v376_v33  ;;  %670 = vmatprep.subr.msk.mxu1 (!%p666_p9), %vm381_vm3, %v458_v34 }
 0x268   : > { %668 = vmatpush1.msk.msra.mxu0 (!%p666_p9), %vm381_vm3, %v979_v0  ;;  %671 = vmatpush1.msk.msra.mxu1 (!%p666_p9), %vm381_vm3, %v981_v1 }
 0x269   : > { %669 = vmatmul.mubr.msk.f32.vlgmr.msra.gmra.mrb[0].mxu0 (!%p666_p9), %vm377_vm4, %v373_v36 }
 0x26a   : > { %v374_v37 = vld [vmem:[#allocation3 + $0x4] sm:$0xf] (!%p666_p9) }
 0x26b   : > { %672 = vmatmul.mubr.msk.f32.vlgmr.msra.gmra.mrb[0].mxu1 (!%p666_p9), %vm377_vm4, %v374_v37  ;;  %v538_v38 = vstv (!%p666_p9), %s537_s16 }
 0x33c   : > { %v452_v39 = vpop.f32.mrb[0].mxu0 }
 0x33d   : > { %v539_v41 = vmul.f32 %v538_v38, %v452_v39  ;;  %v454_v43 = vpop.f32.mrb[1].mxu0 }
 0x33e   : > { %v532_v40 = vpop.f32.mrb[0].mxu1  ;;  %v540_v45 = vmul.f32 %v538_v38, %v454_v43 }
 0x33f   : > { %v541_v42 = vmul.f32 %v538_v38, %v532_v40  ;;  %v534_v44 = vpop.f32.mrb[1].mxu1  ;;  %v545_v47 = vadd.f32 %v539_v41, %v979_v0 }
 0x340   : > { %v542_v46 = vmul.f32 %v538_v38, %v534_v44  ;;  %v546_v49 = vadd.f32 %v540_v45, %v376_v33 }
 0x341   : > { %v547_v48 = vadd.f32 %v541_v42, %v981_v1 }
 0x342   : > { %v548_v50 = vadd.f32 %v542_v46, %v458_v34  ;;  %v553_v51 = vcombine.low %v545_v47, %v546_v49 }
 0x344   : > { %v554_v52 = vcombine.low %v547_v48, %v548_v50  ;;  %557 = vst [vmem:[%s983_s0] sm:$0xff] %v553_v51 }
 0x346   : > { %558 = vst [vmem:[%s983_s0 + $0x8] sm:$0xff] %v554_v52 }
 0x347 PF: > { %s674_s20 = sadd.s32 4294967295, %s859_s13  ;;  %s579_s21 = sshll.u32 %s983_s0, 4  ;;  %s1018_s21 = int_to_ptr.vmem [resolvable:$true] %s579_s21 }
 0x348   : > { %p568_p10 = scmp.gt.s32.totalorder %s674_s20, 0  ;;  %s1027_s26 = scalar_lea.sflag [#allocation7], %s164_s9 }
 0x349   : > { %s788_s27 = scalar_lea.vmem %s1018_s21, 256  ;;  %p1083_p0 = scmp.ne.s32.totalorder %s1076_s18, 0 }
 0x34a   : > { %s1091_s20 = smov (!%p568_p10, %s674_s20), 0  ;;  %p789_p12 = scmp.ne.s32.totalorder %s1018_s21, %s788_s27 }
 0x34b   : > { %s679_s22 = sshll.u32 %s1091_s20, 7  ;;  %s874_s13 = smov [#allocation8]  }
 0x34c   : > { %s1023_s25 = scalar_lea.hbm %s1071_s2, %s679_s22  ;;  %p790_p2 = pnand %p789_p12, %p1083_p0 }
 0x34d   : > { %s792_s28 = sshll.u32 %s874_s13, 4  ;;  %s793_s28 = int_to_ptr.vmem [resolvable:$false] %s792_s28 }
 0x34e   : > { %p791_p3 = pneg %p790_p2  ;;  %s794_s29 = scalar_lea.vmem %s793_s28, 512 }
 0x34f   : > { %p795_p5 = scmp.lt.s32.totalorder %s1018_s21, %s793_s28  ;;  %p796_p7 = scmp.lt.s32.totalorder %s794_s29, %s788_s27 }
 0x351   : > { %p797_p8 = por %p796_p7, %p795_p5 }
 0x353   : > { %p798_p11 = pnand %p797_p8, %p791_p3 }
 0x355   : > { %801 = shalt.err (!%p798_p11)
}
 0x356   : > { %s802_s30 = scalar_lea.hbm %s1023_s25, 256  ;;  %s806_s5 = scalar_lea.hbm %s1071_s2, 256 }
 0x357   : > { %p803_p13 = scmp.ne.s32.totalorder %s1023_s25, %s802_s30  ;;  %p807_p6 = scmp.lt.u32.totalorder %s1023_s25, %s1071_s2 }
 0x358   : > { %p808_p9 = scmp.lt.u32.totalorder %s806_s5, %s802_s30  ;;  %p810_p12 = scmp.lt.u32.totalorder %s802_s30, %s1023_s25 }
 0x359   : > { %p804_p1 = pnand %p803_p13, %p1083_p0 }
 0x35a   : > { %p809_p10 = por %p808_p9, %p807_p6 }
 0x35b   : > { %p805_p4 = pneg %p804_p1 }
 0x35c   : > { %p811_p2 = por %p810_p12, %p809_p10 }
 0x35e   : > { %p812_p3 = pnand %p811_p2, %p805_p4 }
 0x360   : > { %815 = shalt.err (!%p812_p3)
}
 0x361   : > { %s875_s8 = smov 128   ;;  %s876_s9 = smov 8  }
 0x362   : > { %684 = dma.vmem_to_hbm [thread:$0]  (%p1083_p0), %s1018_s21, 256, %s1023_s25, %s1027_s26, %s875_s8, %s875_s8, %s876_s9  }
 0x363 PF: > { %p696_p5 = scmp.ge.s32.totalorder %s867_s15, 2  ;;  %s594_s10 = sand.u32 1, %s851_s11  }
 0x364   : > { %p1084_p7 = scmp.ne.s32.totalorder %s1077_s19, 0  ;;  %s595_s0 = scalar_lea.sflag [#allocation7], %s594_s10 }
 0x366   : > { %p691_p8 = pnand %p696_p5, %p1084_p7 }
 0x368   : > { %845 = dma.done.wait (!%p691_p8), %s595_s0, 256  }
 0x369   : > { %847 = vsyncadd (!%p691_p8), %s595_s0, 4294967040  ;;  %s17_s15 = sadd.s32 1, %s867_s15   ;;  %s1085_s11 = smov %s855_s12 }
 0x36a   : > { %p14_p11 = scmp.ge.s32.totalorder %s17_s15, 4   ;;  %s1059_s12 = smov 0  }
 0x36b   : > { %s1086_s13 = smov %s863_s14  ;;  %s1087_s14 = smov %s1089_s17 }
 0x36c   :  { %16 = sbr.rel (!%p14_p11) target bundleno = 7 (0x7), region = 82 }
 0x373   :  { %600 = vsyncpa [#allocation6], 1 }
 0x374   :  { %602 = vsyncpa [#allocation6 + $0x1], 1 }
 0x375   :  { %603 = vsyncpa [#allocation7], 1 }
 0x376   :  { %605 = vsyncpa [#allocation7 + $0x1], 1 }

</bundles_post_ra>
